<compile_context>
chip_gen: v7x
topology: tpu7x:2x2x1
jax: 0.10.0
libtpu: 0.0.40
codegen_flags: <defaults>
</compile_context>

<pallas_src>
import functools

import jax
import jax.numpy as jnp
import numpy as np
from jax import lax
from jax.experimental import pallas as pl
from jax.experimental.pallas import tpu as pltpu


def _round_up(n, m):
    return ((n + m - 1) // m) * m


def _default_hidden_dtype(compute_dtype):
    """bf16 hidden-state path only where the VPU/EUP supports bf16 (v6e/v7x)."""
    if np.dtype(compute_dtype) == np.dtype(np.float32):
        return np.dtype(np.float32)
    try:
        kind = jax.devices()[0].device_kind.lower()
    except Exception:  # pragma: no cover - defensive
        kind = ""
    if any(tag in kind for tag in ("v6", "v7", "7x")):
        return np.dtype(jnp.bfloat16)
    return np.dtype(np.float32)  # v5e and older: no bf16 VPU/EUP


def _rnn_kernel(x_ref, wih_ref, whh_ref, bias_ref, bfc_ref, wfc_hbm_ref,
                out_ref, xp_ref, h_ref, wfc_vmem_ref, fc_sem,
                *, seq_len, chunk, batch_pad, hidden_dtype, tail_mask):
    """One grid step = one T-chunk: input projection, recurrence, (last) FC."""
    c = pl.program_id(0)
    last = pl.num_programs(0) - 1

    @pl.when(c == 0)
    def _init():
        h_ref[...] = jnp.zeros_like(h_ref)
        # Prefetch the FC weights (only needed after the last chunk) so the
        # HBM->VMEM transfer overlaps with Phases 1-2 of every chunk.
        pltpu.make_async_copy(wfc_hbm_ref, wfc_vmem_ref, fc_sem).start()

    # ---- Phase 1: input projection for ALL timesteps in this chunk as one
    # dense MXU matmul; folded bias added in f32, stored in compute dtype.
    xp_ref[...] = (
        jnp.dot(x_ref[...], wih_ref[...], preferred_element_type=jnp.float32)
        + bias_ref[...]).astype(xp_ref.dtype)

    # ---- Phase 2: serial recurrence over the chunk's timesteps.
    whh = whh_ref[...]                       # hoisted, loaded once per chunk
    cdt = whh.dtype                          # MXU input dtype (bf16 or f32)
    base_t = c * chunk

    def step(t, h):                          # h: (Bp, Hp) hidden_dtype
        row = pl.multiple_of(t * batch_pad, batch_pad)     # aligned sublanes
        xp_t = xp_ref[pl.ds(row, batch_pad), :]            # (Bp, Hp)
        pre = xp_t.astype(hidden_dtype) + jnp.dot(
            h.astype(cdt), whh, preferred_element_type=hidden_dtype)
        h_new = jnp.tanh(pre)
        if tail_mask:                        # only emitted when T % chunk != 0
            h_new = jnp.where(base_t + t < seq_len, h_new, h)
        return h_new

    h0 = h_ref[...]
    h_last = lax.fori_loop(0, chunk, step, h0, unroll=True)  # bounded unroll
    h_ref[...] = h_last

    # ---- Phase 3: final FC on the last hidden state (last chunk only).
    @pl.when(c == last)
    def _fc():
        pltpu.make_async_copy(wfc_hbm_ref, wfc_vmem_ref, fc_sem).wait()
        out_ref[...] = (
            jnp.dot(h_last.astype(wfc_vmem_ref.dtype), wfc_vmem_ref[...],
                    preferred_element_type=jnp.float32)
            + bfc_ref[...]).astype(out_ref.dtype)


def simple_rnn_forward(x, params, *, compute_dtype=jnp.bfloat16,
                       hidden_dtype=None, chunk=None):
    """x: (B, T, I) float32. Returns (B, O) float32."""
    B, T, I = x.shape
    H = params["w_hh"].shape[0]
    O = params["w_fc"].shape[0]

    compute_dtype = np.dtype(compute_dtype)
    if hidden_dtype is None:
        hidden_dtype = _default_hidden_dtype(compute_dtype)
    hidden_dtype = np.dtype(hidden_dtype)

    # Lane/sublane-dense padded shapes (sublane mult of 8, lane mult of 128).
    Bp = _round_up(B, 8)
    Ip = _round_up(I, 128)
    Hp = _round_up(H, 128)
    Op = _round_up(O, 128)

    # Time-chunk size: bound per-chunk residency (~2 MiB) and unroll length.
    if chunk is None:
        bytes_per_step = Bp * (Ip + Hp) * compute_dtype.itemsize
        chunk = max(1, min(T, 64, (2 << 20) // max(bytes_per_step, 1)))
    chunk = int(chunk)
    n_chunks = -(-T // chunk)
    Tp = n_chunks * chunk

    # ---- wrapper-side layout plumbing (zero-padded; padded lanes contribute 0
    #      through the matmuls, padded timesteps are masked in-kernel).
    x_tm = jnp.transpose(x, (1, 0, 2))                                 # (T,B,I)
    x_tm = jnp.pad(x_tm, ((0, Tp - T), (0, Bp - B), (0, Ip - I)))
    x2d = x_tm.reshape(Tp * Bp, Ip).astype(compute_dtype)              # (Tp*Bp, Ip)

    wih_t = jnp.pad(params["w_ih"].T,
                    ((0, Ip - I), (0, Hp - H))).astype(compute_dtype)  # (Ip, Hp)
    whh_t = jnp.pad(params["w_hh"].T,
                    ((0, Hp - H), (0, Hp - H))).astype(compute_dtype)  # (Hp, Hp)
    wfc_t = jnp.pad(params["w_fc"].T,
                    ((0, Hp - H), (0, Op - O))).astype(compute_dtype)  # (Hp, Op)
    bias = jnp.pad((params["b_ih"] + params["b_hh"]).reshape(1, H),
                   ((0, 0), (0, Hp - H))).astype(jnp.float32)          # folded
    bfc = jnp.pad(params["b_fc"].reshape(1, O),
                  ((0, 0), (0, Op - O))).astype(jnp.float32)

    kernel = functools.partial(
        _rnn_kernel, seq_len=T, chunk=chunk, batch_pad=Bp,
        hidden_dtype=hidden_dtype, tail_mask=(Tp != T))

    # Cost estimate (serial recurrence is badly underestimated by XLA).
    itemsize = compute_dtype.itemsize
    flops = 2 * T * Bp * Hp * (Ip + Hp) + 2 * Bp * Hp * Op
    bytes_accessed = (Tp * Bp * Ip * itemsize
                      + (Ip * Hp + Hp * Hp + Hp * Op) * itemsize
                      + (Hp + Op) * 4 + Bp * Op * 4)
    cost = pl.CostEstimate(flops=flops, transcendentals=T * Bp * Hp,
                           bytes_accessed=bytes_accessed)

    # VMEM residency estimate (double-buffered pipelined blocks + scratch).
    resident = (2 * chunk * Bp * Ip * itemsize        # x chunk (x2 buffers)
                + 2 * (Ip + Hp) * Hp * itemsize       # W_ih^T, W_hh^T
                + 2 * 8 * (Hp + Op) * 4               # biases (sublane padded)
                + 2 * Bp * Op * 4                     # output block
                + chunk * Bp * Hp * itemsize          # xp scratch
                + Bp * Hp * hidden_dtype.itemsize     # h carry
                + Hp * Op * itemsize)                 # W_fc staging
    vmem_limit = int(min(max(2 * resident + (4 << 20), 32 << 20), 64 << 20))

    grid_spec = pltpu.PrefetchScalarGridSpec(
        num_scalar_prefetch=0,
        grid=(n_chunks,),
        in_specs=[
            pl.BlockSpec((chunk * Bp, Ip), lambda c: (c, 0)),   # x chunk
            pl.BlockSpec((Ip, Hp), lambda c: (0, 0)),           # W_ih^T
            pl.BlockSpec((Hp, Hp), lambda c: (0, 0)),           # W_hh^T
            pl.BlockSpec((1, Hp), lambda c: (0, 0)),            # folded bias
            pl.BlockSpec((1, Op), lambda c: (0, 0)),            # b_fc
            pl.BlockSpec(memory_space=pl.ANY),                  # W_fc^T (HBM)
        ],
        out_specs=pl.BlockSpec((Bp, Op), lambda c: (0, 0)),
        scratch_shapes=[
            pltpu.VMEM((chunk * Bp, Hp), compute_dtype),        # xp buffer
            pltpu.VMEM((Bp, Hp), hidden_dtype),                 # h carry
            pltpu.VMEM((Hp, Op), compute_dtype),                # W_fc staging
            pltpu.SemaphoreType.DMA,                            # W_fc prefetch
        ],
    )

    out_p = pl.pallas_call(
        kernel,
        out_shape=jax.ShapeDtypeStruct((Bp, Op), jnp.float32),
        grid_spec=grid_spec,
        compiler_params=pltpu.CompilerParams(
            dimension_semantics=("arbitrary",),     # recurrence carried axis
            vmem_limit_bytes=vmem_limit),
        cost_estimate=cost,
    )(x2d, wih_t, whh_t, bias, bfc, wfc_t)

    return out_p[:B, :O]


def init_params(key, input_size, hidden_size, output_size):
    """Deterministic init mimicking PyTorch's U(-1/sqrt(H), 1/sqrt(H))."""
    ks = jax.random.split(key, 6)
    bound = 1.0 / np.sqrt(hidden_size)
    u = lambda k, shape: jax.random.uniform(k, shape, jnp.float32, -bound, bound)
    return {
        "w_ih": u(ks[0], (hidden_size, input_size)),
        "w_hh": u(ks[1], (hidden_size, hidden_size)),
        "b_ih": u(ks[2], (hidden_size,)),
        "b_hh": u(ks[3], (hidden_size,)),
        "w_fc": u(ks[4], (output_size, hidden_size)),
        "b_fc": u(ks[5], (output_size,)),
    }


def reference_forward(x, p):
    """Pure-JAX reference matching PyTorch nn.RNN + nn.Linear semantics."""
    B, T, I = x.shape
    H = p["w_hh"].shape[0]
    h = jnp.zeros((B, H), jnp.float32)
    for t in range(T):
        h = jnp.tanh(x[:, t, :] @ p["w_ih"].T + p["b_ih"]
                     + h @ p["w_hh"].T + p["b_hh"])
    return h @ p["w_fc"].T + p["b_fc"]


if __name__ == "__main__":
    B, T, I, H, O = 4, 8, 16, 32, 8

    key = jax.random.PRNGKey(0)
    k_x, k_p = jax.random.split(key)
    x = jax.random.normal(k_x, (B, T, I), jnp.float32)
    params = init_params(k_p, I, H, O)

    y_ref = reference_forward(x, params)

    # f32 path: matches the PyTorch/JAX reference tightly.
    y_f32 = jax.block_until_ready(
        simple_rnn_forward(x, params, compute_dtype=jnp.float32))
    np.testing.assert_allclose(np.asarray(y_f32), np.asarray(y_ref),
                               rtol=1e-4, atol=1e-4)

    # bf16 default path (bf16 weights/xp; bf16 hidden state on v6e/v7x).
    y_bf16 = jax.block_until_ready(simple_rnn_forward(x, params))
    np.testing.assert_allclose(np.asarray(y_bf16), np.asarray(y_ref),
                               rtol=1e-1, atol=1e-1)

    # Exercise the multi-chunk grid + tail-masked padded timesteps.
    y_chunked = jax.block_until_ready(
        simple_rnn_forward(x, params, compute_dtype=jnp.float32, chunk=3))
    np.testing.assert_allclose(np.asarray(y_chunked), np.asarray(y_ref),
                               rtol=1e-4, atol=1e-4)

    print("KERNEL_OK")
</pallas_src>

<mosaic_0001>
module attributes {stable_mosaic.version = 11 : i64} {
  func.func @_rnn_kernel(%arg0: i32, %arg1: memref<64x128xf32, #tpu.memory_space<vmem>>, %arg2: memref<128x128xf32, #tpu.memory_space<vmem>>, %arg3: memref<128x128xf32, #tpu.memory_space<vmem>>, %arg4: memref<1x128xf32, #tpu.memory_space<vmem>>, %arg5: memref<1x128xf32, #tpu.memory_space<vmem>>, %arg6: memref<128x128xf32, #tpu.memory_space<any>>, %arg7: memref<8x128xf32, #tpu.memory_space<vmem>>, %arg8: memref<64x128xf32, #tpu.memory_space<vmem>>, %arg9: memref<8x128xf32, #tpu.memory_space<vmem>>, %arg10: memref<128x128xf32, #tpu.memory_space<vmem>>, %arg11: memref<!tpu.dma_semaphore, #tpu.memory_space<semaphore_mem>>) attributes {dimension_semantics = [#tpu.dimension_semantics<arbitrary>], iteration_bounds = array<i64: 1>, scalar_prefetch = 0 : i64, scratch_operands = 4 : i64, tpu.core_type = #tpu.core_type<tc>, window_params = [{transform_indices = @transform_0, window_bounds = array<i64: 64, 128>}, {pipeline_mode = #tpu.pipeline_mode<synchronous>, transform_indices = @transform_1, window_bounds = array<i64: 128, 128>}, {pipeline_mode = #tpu.pipeline_mode<synchronous>, transform_indices = @transform_2, window_bounds = array<i64: 128, 128>}, {pipeline_mode = #tpu.pipeline_mode<synchronous>, transform_indices = @transform_3, window_bounds = array<i64: 1, 128>}, {pipeline_mode = #tpu.pipeline_mode<synchronous>, transform_indices = @transform_4, window_bounds = array<i64: 1, 128>}, {}, {pipeline_mode = #tpu.pipeline_mode<synchronous>, transform_indices = @transform_6, window_bounds = array<i64: 8, 128>}]} {
    %c0_i32 = arith.constant 0 : i32
    %0 = arith.cmpi eq, %arg0, %c0_i32 : i32
    %1 = arith.extui %0 : i1 to i32
    %c0_i32_0 = arith.constant 0 : i32
    %2 = arith.cmpi ne, %1, %c0_i32_0 : i32
    scf.if %2 {
      %cst_41 = arith.constant 0.000000e+00 : f32
      %72 = vector.broadcast %cst_41 : f32 to vector<8x128xf32>
      %c0_42 = arith.constant 0 : index
      %c0_43 = arith.constant 0 : index
      %73 = vector.load %arg9[%c0_42, %c0_43] : memref<8x128xf32, #tpu.memory_space<vmem>>, vector<8x128xf32>
      tpu.vector_store %arg9[%c0_42, %c0_43], %72 {strides = array<i32>} : memref<8x128xf32, #tpu.memory_space<vmem>>, vector<8x128xf32>,
      tpu.enqueue_dma source(%arg6 : memref<128x128xf32, #tpu.memory_space<any>>) target(%arg10 : memref<128x128xf32, #tpu.memory_space<vmem>>) target_semaphore(%arg11 : memref<!tpu.dma_semaphore, #tpu.memory_space<semaphore_mem>>)
    } else {
    }
    %c0 = arith.constant 0 : index
    %c0_1 = arith.constant 0 : index
    %3 = vector.load %arg1[%c0, %c0_1] : memref<64x128xf32, #tpu.memory_space<vmem>>, vector<64x128xf32>
    %c0_2 = arith.constant 0 : index
    %c0_3 = arith.constant 0 : index
    %4 = vector.load %arg2[%c0_2, %c0_3] : memref<128x128xf32, #tpu.memory_space<vmem>>, vector<128x128xf32>
    %cst = arith.constant dense<0.000000e+00> : vector<64x128xf32>
    %5 = tpu.matmul %3, %4, %cst {dimension_numbers = #tpu.dot_dimension_numbers<[1], [0], [0], [1], [0, 0, 1, 1], [], []>} : vector<64x128xf32>, vector<128x128xf32>, vector<64x128xf32> -> vector<64x128xf32>
    %c0_4 = arith.constant 0 : index
    %c0_5 = arith.constant 0 : index
    %6 = vector.load %arg4[%c0_4, %c0_5] : memref<1x128xf32, #tpu.memory_space<vmem>>, vector<1x128xf32>
    %7 = vector.broadcast %6 : vector<1x128xf32> to vector<64x128xf32>
    %8 = arith.addf %5, %7 : vector<64x128xf32>
    %c0_6 = arith.constant 0 : index
    %c0_7 = arith.constant 0 : index
    %9 = vector.load %arg8[%c0_6, %c0_7] : memref<64x128xf32, #tpu.memory_space<vmem>>, vector<64x128xf32>
    tpu.vector_store %arg8[%c0_6, %c0_7], %8 {strides = array<i32>} : memref<64x128xf32, #tpu.memory_space<vmem>>, vector<64x128xf32>,
    %c0_8 = arith.constant 0 : index
    %c0_9 = arith.constant 0 : index
    %10 = vector.load %arg3[%c0_8, %c0_9] : memref<128x128xf32, #tpu.memory_space<vmem>>, vector<128x128xf32>
    %c0_10 = arith.constant 0 : index
    %c0_11 = arith.constant 0 : index
    %11 = vector.load %arg9[%c0_10, %c0_11] : memref<8x128xf32, #tpu.memory_space<vmem>>, vector<8x128xf32>
    %c0_i32_12 = arith.constant 0 : i32
    %c8_i32 = arith.constant 8 : i32
    %12 = arith.muli %c0_i32_12, %c8_i32 : i32
    %13 = tpu.assume_multiple %12, 8 : i32
    %14 = arith.index_cast %13 : i32 to index
    %c0_13 = arith.constant 0 : index
    %15 = vector.load %arg8[%14, %c0_13] : memref<64x128xf32, #tpu.memory_space<vmem>>, vector<8x128xf32>
    %cst_14 = arith.constant dense<0.000000e+00> : vector<8x128xf32>
    %16 = tpu.matmul %11, %10, %cst_14 {dimension_numbers = #tpu.dot_dimension_numbers<[1], [0], [0], [1], [0, 0, 1, 1], [], []>} : vector<8x128xf32>, vector<128x128xf32>, vector<8x128xf32> -> vector<8x128xf32>
    %17 = arith.addf %15, %16 : vector<8x128xf32>
    %18 = math.tanh %17 : vector<8x128xf32>
    %c1_i32 = arith.constant 1 : i32
    %c8_i32_15 = arith.constant 8 : i32
    %19 = arith.muli %c1_i32, %c8_i32_15 : i32
    %20 = tpu.assume_multiple %19, 8 : i32
    %21 = arith.index_cast %20 : i32 to index
    %c0_16 = arith.constant 0 : index
    %22 = vector.load %arg8[%21, %c0_16] : memref<64x128xf32, #tpu.memory_space<vmem>>, vector<8x128xf32>
    %cst_17 = arith.constant dense<0.000000e+00> : vector<8x128xf32>
    %23 = tpu.matmul %18, %10, %cst_17 {dimension_numbers = #tpu.dot_dimension_numbers<[1], [0], [0], [1], [0, 0, 1, 1], [], []>} : vector<8x128xf32>, vector<128x128xf32>, vector<8x128xf32> -> vector<8x128xf32>
    %24 = arith.addf %22, %23 : vector<8x128xf32>
    %25 = math.tanh %24 : vector<8x128xf32>
    %c2_i32 = arith.constant 2 : i32
    %c8_i32_18 = arith.constant 8 : i32
    %26 = arith.muli %c2_i32, %c8_i32_18 : i32
    %27 = tpu.assume_multiple %26, 8 : i32
    %28 = arith.index_cast %27 : i32 to index
    %c0_19 = arith.constant 0 : index
    %29 = vector.load %arg8[%28, %c0_19] : memref<64x128xf32, #tpu.memory_space<vmem>>, vector<8x128xf32>
    %cst_20 = arith.constant dense<0.000000e+00> : vector<8x128xf32>
    %30 = tpu.matmul %25, %10, %cst_20 {dimension_numbers = #tpu.dot_dimension_numbers<[1], [0], [0], [1], [0, 0, 1, 1], [], []>} : vector<8x128xf32>, vector<128x128xf32>, vector<8x128xf32> -> vector<8x128xf32>
    %31 = arith.addf %29, %30 : vector<8x128xf32>
    %32 = math.tanh %31 : vector<8x128xf32>
    %c3_i32 = arith.constant 3 : i32
    %c8_i32_21 = arith.constant 8 : i32
    %33 = arith.muli %c3_i32, %c8_i32_21 : i32
    %34 = tpu.assume_multiple %33, 8 : i32
    %35 = arith.index_cast %34 : i32 to index
    %c0_22 = arith.constant 0 : index
    %36 = vector.load %arg8[%35, %c0_22] : memref<64x128xf32, #tpu.memory_space<vmem>>, vector<8x128xf32>
    %cst_23 = arith.constant dense<0.000000e+00> : vector<8x128xf32>
    %37 = tpu.matmul %32, %10, %cst_23 {dimension_numbers = #tpu.dot_dimension_numbers<[1], [0], [0], [1], [0, 0, 1, 1], [], []>} : vector<8x128xf32>, vector<128x128xf32>, vector<8x128xf32> -> vector<8x128xf32>
    %38 = arith.addf %36, %37 : vector<8x128xf32>
    %39 = math.tanh %38 : vector<8x128xf32>
    %c4_i32 = arith.constant 4 : i32
    %c8_i32_24 = arith.constant 8 : i32
    %40 = arith.muli %c4_i32, %c8_i32_24 : i32
    %41 = tpu.assume_multiple %40, 8 : i32
    %42 = arith.index_cast %41 : i32 to index
    %c0_25 = arith.constant 0 : index
    %43 = vector.load %arg8[%42, %c0_25] : memref<64x128xf32, #tpu.memory_space<vmem>>, vector<8x128xf32>
    %cst_26 = arith.constant dense<0.000000e+00> : vector<8x128xf32>
    %44 = tpu.matmul %39, %10, %cst_26 {dimension_numbers = #tpu.dot_dimension_numbers<[1], [0], [0], [1], [0, 0, 1, 1], [], []>} : vector<8x128xf32>, vector<128x128xf32>, vector<8x128xf32> -> vector<8x128xf32>
    %45 = arith.addf %43, %44 : vector<8x128xf32>
    %46 = math.tanh %45 : vector<8x128xf32>
    %c5_i32 = arith.constant 5 : i32
    %c8_i32_27 = arith.constant 8 : i32
    %47 = arith.muli %c5_i32, %c8_i32_27 : i32
    %48 = tpu.assume_multiple %47, 8 : i32
    %49 = arith.index_cast %48 : i32 to index
    %c0_28 = arith.constant 0 : index
    %50 = vector.load %arg8[%49, %c0_28] : memref<64x128xf32, #tpu.memory_space<vmem>>, vector<8x128xf32>
    %cst_29 = arith.constant dense<0.000000e+00> : vector<8x128xf32>
    %51 = tpu.matmul %46, %10, %cst_29 {dimension_numbers = #tpu.dot_dimension_numbers<[1], [0], [0], [1], [0, 0, 1, 1], [], []>} : vector<8x128xf32>, vector<128x128xf32>, vector<8x128xf32> -> vector<8x128xf32>
    %52 = arith.addf %50, %51 : vector<8x128xf32>
    %53 = math.tanh %52 : vector<8x128xf32>
    %c6_i32 = arith.constant 6 : i32
    %c8_i32_30 = arith.constant 8 : i32
    %54 = arith.muli %c6_i32, %c8_i32_30 : i32
    %55 = tpu.assume_multiple %54, 8 : i32
    %56 = arith.index_cast %55 : i32 to index
    %c0_31 = arith.constant 0 : index
    %57 = vector.load %arg8[%56, %c0_31] : memref<64x128xf32, #tpu.memory_space<vmem>>, vector<8x128xf32>
    %cst_32 = arith.constant dense<0.000000e+00> : vector<8x128xf32>
    %58 = tpu.matmul %53, %10, %cst_32 {dimension_numbers = #tpu.dot_dimension_numbers<[1], [0], [0], [1], [0, 0, 1, 1], [], []>} : vector<8x128xf32>, vector<128x128xf32>, vector<8x128xf32> -> vector<8x128xf32>
    %59 = arith.addf %57, %58 : vector<8x128xf32>
    %60 = math.tanh %59 : vector<8x128xf32>
    %c7_i32 = arith.constant 7 : i32
    %c8_i32_33 = arith.constant 8 : i32
    %61 = arith.muli %c7_i32, %c8_i32_33 : i32
    %62 = tpu.assume_multiple %61, 8 : i32
    %63 = arith.index_cast %62 : i32 to index
    %c0_34 = arith.constant 0 : index
    %64 = vector.load %arg8[%63, %c0_34] : memref<64x128xf32, #tpu.memory_space<vmem>>, vector<8x128xf32>
    %cst_35 = arith.constant dense<0.000000e+00> : vector<8x128xf32>
    %65 = tpu.matmul %60, %10, %cst_35 {dimension_numbers = #tpu.dot_dimension_numbers<[1], [0], [0], [1], [0, 0, 1, 1], [], []>} : vector<8x128xf32>, vector<128x128xf32>, vector<8x128xf32> -> vector<8x128xf32>
    %66 = arith.addf %64, %65 : vector<8x128xf32>
    %67 = math.tanh %66 : vector<8x128xf32>
    %c8_i32_36 = arith.constant 8 : i32
    %c0_37 = arith.constant 0 : index
    %c0_38 = arith.constant 0 : index
    %68 = vector.load %arg9[%c0_37, %c0_38] : memref<8x128xf32, #tpu.memory_space<vmem>>, vector<8x128xf32>
    tpu.vector_store %arg9[%c0_37, %c0_38], %67 {strides = array<i32>} : memref<8x128xf32, #tpu.memory_space<vmem>>, vector<8x128xf32>,
    %c0_i32_39 = arith.constant 0 : i32
    %69 = arith.cmpi eq, %arg0, %c0_i32_39 : i32
    %70 = arith.extui %69 : i1 to i32
    %c0_i32_40 = arith.constant 0 : i32
    %71 = arith.cmpi ne, %70, %c0_i32_40 : i32
    scf.if %71 {
      tpu.wait_dma2 semaphore(%arg11 : memref<!tpu.dma_semaphore, #tpu.memory_space<semaphore_mem>>) src(%arg6 : memref<128x128xf32, #tpu.memory_space<any>>) dst(%arg10 : memref<128x128xf32, #tpu.memory_space<vmem>>)
      %c0_41 = arith.constant 0 : index
      %c0_42 = arith.constant 0 : index
      %72 = vector.load %arg10[%c0_41, %c0_42] : memref<128x128xf32, #tpu.memory_space<vmem>>, vector<128x128xf32>
      %cst_43 = arith.constant dense<0.000000e+00> : vector<8x128xf32>
      %73 = tpu.matmul %67, %72, %cst_43 {dimension_numbers = #tpu.dot_dimension_numbers<[1], [0], [0], [1], [0, 0, 1, 1], [], []>} : vector<8x128xf32>, vector<128x128xf32>, vector<8x128xf32> -> vector<8x128xf32>
      %c0_44 = arith.constant 0 : index
      %c0_45 = arith.constant 0 : index
      %74 = vector.load %arg5[%c0_44, %c0_45] : memref<1x128xf32, #tpu.memory_space<vmem>>, vector<1x128xf32>
      %75 = vector.broadcast %74 : vector<1x128xf32> to vector<8x128xf32>
      %76 = arith.addf %73, %75 : vector<8x128xf32>
      %c0_46 = arith.constant 0 : index
      %c0_47 = arith.constant 0 : index
      %77 = vector.load %arg7[%c0_46, %c0_47] : memref<8x128xf32, #tpu.memory_space<vmem>>, vector<8x128xf32>
      tpu.vector_store %arg7[%c0_46, %c0_47], %76 {strides = array<i32>} : memref<8x128xf32, #tpu.memory_space<vmem>>, vector<8x128xf32>,
    } else {
    }
    return
  }
  func.func @transform_0(%arg0: i32) -> (i32, i32) {
    %c0_i32 = arith.constant 0 : i32
    %c0_i32_0 = arith.constant 0 : i32
    return %arg0, %c0_i32 : i32, i32
  }
  func.func @transform_1(%arg0: i32) -> (i32, i32) {
    %c0_i32 = arith.constant 0 : i32
    %c0_i32_0 = arith.constant 0 : i32
    %c0_i32_1 = arith.constant 0 : i32
    return %c0_i32, %c0_i32_0 : i32, i32
  }
  func.func @transform_2(%arg0: i32) -> (i32, i32) {
    %c0_i32 = arith.constant 0 : i32
    %c0_i32_0 = arith.constant 0 : i32
    %c0_i32_1 = arith.constant 0 : i32
    return %c0_i32, %c0_i32_0 : i32, i32
  }
  func.func @transform_3(%arg0: i32) -> (i32, i32) {
    %c0_i32 = arith.constant 0 : i32
    %c0_i32_0 = arith.constant 0 : i32
    %c0_i32_1 = arith.constant 0 : i32
    return %c0_i32, %c0_i32_0 : i32, i32
  }
  func.func @transform_4(%arg0: i32) -> (i32, i32) {
    %c0_i32 = arith.constant 0 : i32
    %c0_i32_0 = arith.constant 0 : i32
    %c0_i32_1 = arith.constant 0 : i32
    return %c0_i32, %c0_i32_0 : i32, i32
  }
  func.func @transform_6(%arg0: i32) -> (i32, i32) {
    %c0_i32 = arith.constant 0 : i32
    %c0_i32_0 = arith.constant 0 : i32
    %c0_i32_1 = arith.constant 0 : i32
    return %c0_i32, %c0_i32_0 : i32, i32
  }
}

</mosaic_0001>

<bundles_post_ra>
// kernel: tpu_custom_call.1
= control target key start
LH: loop header
LB: loop body
LE: loop exit
PB: predicated region body
PF: predicated region fallthrough
CT: control target
= control target key end

     0   :  { %11 = vsyncpa [#allocation7], 0  ;;  %s2205_s0 = inlined_call_operand.hbm [shape: f32[64,128], index: 0, kind: input, shape index: {}]   ;;  %s2206_s1 = inlined_call_operand.hbm [shape: f32[128,128], index: 1, kind: input, shape index: {}]   ;;  %s2207_s2 = inlined_call_operand.hbm [shape: f32[128,128], index: 2, kind: input, shape index: {}]   ;;  %s2208_s3 = inlined_call_operand.vmem [shape: f32[1,128], index: 3, kind: input, shape index: {}]   ;;  %s2209_s4 = inlined_call_operand.vmem [shape: f32[1,128], index: 4, kind: input, shape index: {}]   ;;  %s2210_s5 = inlined_call_operand.hbm [shape: f32[128,128], index: 5, kind: input, shape index: {}]   ;;  %s2211_s6 = inlined_call_operand.hbm [shape: f32[8,128], index: 6, kind: output, shape index: {}]  }
   0x1   :  { %12 = vsyncpa [#allocation10], 0 }
   0x2   :  { %13 = vsyncpa [#allocation8], 0  ;;  %s1885_s21 = smov [#allocation9]   ;;  %s1886_s23 = smov [#allocation6]  }
   0x3   :  { %s31_s22 = sshll.u32 %s1885_s21, 4  ;;  %s19_s24 = sshll.u32 %s1886_s23, 4  ;;  %s32_s22 = int_to_ptr.vmem [resolvable:$true] %s31_s22  ;;  %s1930_s24 = int_to_ptr.vmem [resolvable:$true] %s19_s24 }
   0x4   :  { %s1767_s27 = scalar_lea.hbm %s2206_s1, 2048 }
   0x5   :  { %p1768_p0 = scmp.ne.s32.totalorder %s2206_s1, %s1767_s27  ;;  %p1771_p1 = scmp.lt.u32.totalorder %s1767_s27, %s2206_s1 }
   0x7   :  { %p1773_p2 = pnand %p1771_p1, %p1768_p0 }
   0x9   :  { %1776 = shalt.err (!%p1773_p2)
}
   0xa   :  { %s1777_s8 = scalar_lea.vmem %s32_s22, 2048  ;;  %p1782_p4 = scmp.lt.s32.totalorder %s32_s22, %s32_s22 }
   0xb   :  { %p1778_p3 = scmp.ne.s32.totalorder %s32_s22, %s1777_s8  ;;  %p1783_p5 = scmp.lt.s32.totalorder %s1777_s8, %s1777_s8 }
   0xd   :  { %p1784_p6 = por %p1783_p5, %p1782_p4 }
   0xf   :  { %p1785_p7 = pnand %p1784_p6, %p1778_p3 }
  0x11   :  { %1788 = shalt.err (!%p1785_p7)
}
  0x12   :  { %s1887_s9 = smov 128   ;;  %s1888_s10 = smov 8  }
  0x13   :  { %37 = dma.hbm_to_vmem [thread:$0]  %s2206_s1, 2048, %s32_s22, [#allocation10], %s1887_s9, %s1887_s9, %s1888_s10  }
  0x14   :  { %s1789_s15 = scalar_lea.hbm %s2205_s0, 1024 }
  0x15   :  { %p1790_p8 = scmp.ne.s32.totalorder %s2205_s0, %s1789_s15  ;;  %p1793_p9 = scmp.lt.u32.totalorder %s1789_s15, %s2205_s0 }
  0x17   :  { %p1795_p10 = pnand %p1793_p9, %p1790_p8 }
  0x19   :  { %1798 = shalt.err (!%p1795_p10)
}
  0x1a   :  { %s1799_s20 = scalar_lea.vmem %s1930_s24, 1024  ;;  %p1804_p12 = scmp.lt.s32.totalorder %s1930_s24, %s1930_s24 }
  0x1b   :  { %p1800_p11 = scmp.ne.s32.totalorder %s1930_s24, %s1799_s20  ;;  %p1805_p13 = scmp.lt.s32.totalorder %s1799_s20, %s1799_s20 }
  0x1d   :  { %p1806_p0 = por %p1805_p13, %p1804_p12 }
  0x1f   :  { %p1807_p1 = pnand %p1806_p0, %p1800_p11 }
  0x21   :  { %1810 = shalt.err (!%p1807_p1)
}
  0x22   :  { %25 = dma.hbm_to_vmem [thread:$0]  %s2205_s0, 1024, %s1930_s24, [#allocation7], %s1887_s9, %s1887_s9, %s1888_s10  }
  0x23   :  { %s1889_s22 = smov [#allocation11]   ;;  %s1811_s27 = scalar_lea.hbm %s2207_s2, 2048 }
  0x24   :  { %s43_s23 = sshll.u32 %s1889_s22, 4  ;;  %p1812_p2 = scmp.ne.s32.totalorder %s2207_s2, %s1811_s27  ;;  %s44_s23 = int_to_ptr.vmem [resolvable:$true] %s43_s23 }
  0x25   :  { %p1815_p3 = scmp.lt.u32.totalorder %s1811_s27, %s2207_s2 }
  0x27   :  { %p1817_p4 = pnand %p1815_p3, %p1812_p2 }
  0x29   :  { %1820 = shalt.err (!%p1817_p4)
}
  0x2a   :  { %s1821_s8 = scalar_lea.vmem %s44_s23, 2048  ;;  %p1826_p6 = scmp.lt.s32.totalorder %s44_s23, %s44_s23 }
  0x2b   :  { %p1822_p5 = scmp.ne.s32.totalorder %s44_s23, %s1821_s8  ;;  %p1827_p7 = scmp.lt.s32.totalorder %s1821_s8, %s1821_s8 }
  0x2d   :  { %p1828_p8 = por %p1827_p7, %p1826_p6 }
  0x2f   :  { %p1829_p9 = pnand %p1828_p8, %p1822_p5 }
  0x31   :  { %1832 = shalt.err (!%p1829_p9)
}
  0x32   :  { %49 = dma.hbm_to_vmem [thread:$0]  %s2207_s2, 2048, %s44_s23, [#allocation10], %s1887_s9, %s1887_s9, %s1888_s10  }
  0x33   :  { %1877 = dma.done.wait [#allocation7], 1024  }
  0x34   :  { %1878 = vsyncadd [#allocation7], 4294966272 }
  0x35   :  { %1879 = dma.done.wait [#allocation10], 4096  }
  0x36   :  { %1880 = vsyncadd [#allocation10], 4294963200  ;;  %v1890_v0 = vmov 0.0|0.0   ;;  %vm1891_vm0 = vmmov 0   ;;  %v1892_v1 = vmov 0.0   ;;  %v87_v2 = vld [vmem:[#allocation9] sm:$0xff] }
  0x37   :  { %1525 = vmatprep.subr.bf16.mxu1 %v1890_v0  ;;  %1210 = vmatprep.mubr.msk.f32.mxu1 %vm1891_vm0, %v1892_v1  ;;  %v88_v3 = vld [vmem:[#allocation9 + $0x8] sm:$0xff]  ;;  %v223_v4 = vld [vmem:[#allocation11] sm:$0xff]  ;;  %v89_v7 = vld [vmem:[#allocation9 + $0x10] sm:$0xff]  ;;  %s1833_s13 = scalar_lea.hbm %s2210_s5, 2048 }
  0x38   :  { %v1493_v5 = vpack.c.bf16 %v88_v3, %v87_v2  ;;  %v224_v6 = vld [vmem:[#allocation11 + $0x8] sm:$0xff]  ;;  %v90_v8 = vld [vmem:[#allocation9 + $0x18] sm:$0xff]  ;;  %v225_v11 = vld [vmem:[#allocation11 + $0x10] sm:$0xff]  ;;  %p1834_p10 = scmp.ne.s32.totalorder %s2210_s5, %s1833_s13  ;;  %p1837_p11 = scmp.lt.u32.totalorder %s1833_s13, %s2210_s5 }
  0x39   :  { %v1985_v9 = vpack.c.bf16 %v224_v6, %v223_v4  ;;  %v1497_v10 = vpack.c.bf16 %v90_v8, %v89_v7  ;;  %v226_v12 = vld [vmem:[#allocation11 + $0x18] sm:$0xff]  ;;  %v91_v13 = vld [vmem:[#allocation9 + $0x20] sm:$0xff]  ;;  %v92_v14 = vld [vmem:[#allocation9 + $0x28] sm:$0xff] }
  0x3a   :  { %1494 = vmatprep.subr.bf16.mxu0 %v1493_v5  ;;  %v1988_v15 = vpack.c.bf16 %v226_v12, %v225_v11  ;;  %v1501_v16 = vpack.c.bf16 %v92_v14, %v91_v13  ;;  %v227_v17 = vld [vmem:[#allocation11 + $0x20] sm:$0xff]  ;;  %v228_v18 = vld [vmem:[#allocation11 + $0x28] sm:$0xff]  ;;  %v93_v19 = vld [vmem:[#allocation9 + $0x30] sm:$0xff]  ;;  %p1839_p12 = pnand %p1837_p11, %p1834_p10 }
  0x3b   :  { %1496 = vmatpush3.bf16.msra.mxu0 %v1493_v5  ;;  %1527 = vmatpush3.bf16.msra.mxu1 %v1985_v9  ;;  %v94_v20 = vld [vmem:[#allocation9 + $0x38] sm:$0xff]  ;;  %v1992_v21 = vpack.c.bf16 %v228_v18, %v227_v17  ;;  %v229_v23 = vld [vmem:[#allocation11 + $0x30] sm:$0xff]  ;;  %v95_v25 = vld [vmem:[#allocation9 + $0x40] sm:$0xff] }
  0x3c   :  { %1498 = vmatprep.subr.bf16.mxu0 %v1497_v10  ;;  %1528 = vmatprep.subr.bf16.mxu1 %v1890_v0  ;;  %v1505_v22 = vpack.c.bf16 %v94_v20, %v93_v19  ;;  %v230_v24 = vld [vmem:[#allocation11 + $0x38] sm:$0xff]  ;;  %v96_v26 = vld [vmem:[#allocation9 + $0x48] sm:$0xff]  ;;  %v79_v27 = vld [vmem:[#allocation6] sm:$0xff] }
  0x3d   :  { %1166 = vmatprep.mubr.f32.mxu0 %v79_v27  ;;  %v1996_v28 = vpack.c.bf16 %v230_v24, %v229_v23  ;;  %v1509_v29 = vpack.c.bf16 %v96_v26, %v95_v25  ;;  %v231_v30 = vld [vmem:[#allocation11 + $0x40] sm:$0xff]  ;;  %v232_v31 = vld [vmem:[#allocation11 + $0x48] sm:$0xff]  ;;  %v97_v32 = vld [vmem:[#allocation9 + $0x50] sm:$0xff] }
  0x3e   :  { %v98_v33 = vld [vmem:[#allocation9 + $0x58] sm:$0xff]  ;;  %v2000_v34 = vpack.c.bf16 %v232_v31, %v231_v30  ;;  %v233_v36 = vld [vmem:[#allocation11 + $0x50] sm:$0xff]  ;;  %v99_v38 = vld [vmem:[#allocation9 + $0x60] sm:$0xff] }
  0x3f   :  { %1500 = vmatpush3.bf16.msra.mxu0 %v1497_v10  ;;  %1530 = vmatpush3.bf16.msra.mxu1 %v1988_v15  ;;  %v1513_v35 = vpack.c.bf16 %v98_v33, %v97_v32  ;;  %v234_v37 = vld [vmem:[#allocation11 + $0x58] sm:$0xff]  ;;  %v100_v39 = vld [vmem:[#allocation9 + $0x68] sm:$0xff]  ;;  %v235_v42 = vld [vmem:[#allocation11 + $0x60] sm:$0xff] }
  0x40   :  { %1502 = vmatprep.subr.bf16.mxu0 %v1501_v16  ;;  %1531 = vmatprep.subr.bf16.mxu1 %v1890_v0  ;;  %v2004_v40 = vpack.c.bf16 %v234_v37, %v233_v36  ;;  %v1517_v41 = vpack.c.bf16 %v100_v39, %v99_v38  ;;  %v236_v43 = vld [vmem:[#allocation11 + $0x68] sm:$0xff]  ;;  %v101_v44 = vld [vmem:[#allocation9 + $0x70] sm:$0xff]  ;;  %v102_v45 = vld [vmem:[#allocation9 + $0x78] sm:$0xff] }
  0x41   :  { %v2008_v46 = vpack.c.bf16 %v236_v43, %v235_v42  ;;  %v1521_v47 = vpack.c.bf16 %v102_v45, %v101_v44  ;;  %v237_v48 = vld [vmem:[#allocation11 + $0x70] sm:$0xff]  ;;  %v238_v49 = vld [vmem:[#allocation11 + $0x78] sm:$0xff]  ;;  %v80_v51 = vld [vmem:[#allocation6 + $0x8] sm:$0xff] }
  0x42   :  { %v2012_v50 = vpack.c.bf16 %v238_v49, %v237_v48  ;;  %v81_v52 = vld [vmem:[#allocation6 + $0x10] sm:$0xff]  ;;  %v82_v53 = vld [vmem:[#allocation6 + $0x18] sm:$0xff]  ;;  %v83_v54 = vld [vmem:[#allocation6 + $0x20] sm:$0xff] }
  0x43   :  { %1504 = vmatpush3.bf16.msra.mxu0 %v1501_v16  ;;  %1533 = vmatpush3.bf16.msra.mxu1 %v1992_v21  ;;  %v84_v55 = vld [vmem:[#allocation6 + $0x28] sm:$0xff]  ;;  %v85_v56 = vld [vmem:[#allocation6 + $0x30] sm:$0xff]  ;;  %v86_v57 = vld [vmem:[#allocation6 + $0x38] sm:$0xff] }
  0x44   :  { %1506 = vmatprep.subr.bf16.mxu0 %v1505_v22  ;;  %1534 = vmatprep.subr.bf16.mxu1 %v1890_v0  ;;  %v2058_v58 = vld [vmem:[%s2208_s3] ss:$0 sm:$0xff]  ;;  %s1893_s3 = smov [#allocation4]  }
  0x45   :  { %s75_s10 = sshll.u32 %s1893_s3, 4  ;;  %s76_s10 = int_to_ptr.vmem [resolvable:$true] %s75_s10 }
  0x47   :  { %1508 = vmatpush3.bf16.msra.mxu0 %v1505_v22  ;;  %1536 = vmatpush3.bf16.msra.mxu1 %v1996_v28 }
  0x48   :  { %1510 = vmatprep.subr.bf16.mxu0 %v1509_v29  ;;  %1537 = vmatprep.subr.bf16.mxu1 %v1890_v0 }
  0x4b   :  { %1512 = vmatpush3.bf16.msra.mxu0 %v1509_v29  ;;  %1539 = vmatpush3.bf16.msra.mxu1 %v2000_v34 }
  0x4c   :  { %1514 = vmatprep.subr.bf16.mxu0 %v1513_v35  ;;  %1540 = vmatprep.subr.bf16.mxu1 %v1890_v0 }
  0x4f   :  { %1516 = vmatpush3.bf16.msra.mxu0 %v1513_v35  ;;  %1542 = vmatpush3.bf16.msra.mxu1 %v2004_v40 }
  0x50   :  { %1518 = vmatprep.subr.bf16.mxu0 %v1517_v41  ;;  %1543 = vmatprep.subr.bf16.mxu1 %v1890_v0 }
  0x53   :  { %1520 = vmatpush3.bf16.msra.mxu0 %v1517_v41  ;;  %1545 = vmatpush3.bf16.msra.mxu1 %v2008_v46 }
  0x54   :  { %1522 = vmatprep.subr.bf16.mxu0 %v1521_v47  ;;  %1546 = vmatprep.subr.bf16.mxu1 %v1890_v0 }
  0x57   :  { %1524 = vmatpush3.bf16.msra.mxu0 %v1521_v47  ;;  %1548 = vmatpush3.bf16.msra.mxu1 %v2012_v50 }
  0x58   :  { %1549 = vmatprep.subr.bf16.mxu0 %v1890_v0  ;;  %1573 = vmatprep.subr.bf16.mxu1 %v1890_v0 }
  0x5a   :  { %1167 = vmatmul.mubr.f32.vlgmr.msra.gmra.mrb[0].mxu0 %v80_v51  ;;  %1211 = vmatmul.mubr.f32.vlgmr.msra.gmra.mrb[0].mxu1 %v1892_v1 }
  0x5b   :  { %1551 = vmatpush3.bf16.msra.mxu0 %v1985_v9  ;;  %1575 = vmatpush3.bf16.msra.mxu1 %v1985_v9 }
  0x5c   :  { %1552 = vmatprep.subr.bf16.mxu0 %v1890_v0  ;;  %1576 = vmatprep.subr.bf16.mxu1 %v1890_v0 }
  0x5d   :  { %1280 = vmatprep.mubr.msk.f32.mxu1 %vm1891_vm0, %v1892_v1  ;;  %1169 = vmatprep.mubr.f32.mxu0 %v81_v52 }
  0x5e   :  { %1170 = vmatmul.mubr.f32.gmra.mrb[2].mxu0 %v82_v53 }
  0x5f   :  { %1554 = vmatpush3.bf16.msra.mxu0 %v1988_v15  ;;  %1578 = vmatpush3.bf16.msra.mxu1 %v1988_v15 }
  0x60   :  { %1555 = vmatprep.subr.bf16.mxu0 %v1890_v0  ;;  %1579 = vmatprep.subr.bf16.mxu1 %v1890_v0 }
  0x61   :  { %1172 = vmatprep.mubr.f32.mxu0 %v83_v54 }
  0x62   :  { %1173 = vmatmul.mubr.f32.gmra.mrb[4].mxu0 %v84_v55 }
  0x63   :  { %1557 = vmatpush3.bf16.msra.mxu0 %v1992_v21  ;;  %1581 = vmatpush3.bf16.msra.mxu1 %v1992_v21 }
  0x64   :  { %1558 = vmatprep.subr.bf16.mxu0 %v1890_v0  ;;  %1582 = vmatprep.subr.bf16.mxu1 %v1890_v0 }
  0x65   :  { %1175 = vmatprep.mubr.f32.mxu0 %v85_v56 }
  0x66   :  { %1176 = vmatmul.mubr.f32.gmra.mrb[6].mxu0 %v86_v57 }
  0x67   :  { %1560 = vmatpush3.bf16.msra.mxu0 %v1996_v28  ;;  %1584 = vmatpush3.bf16.msra.mxu1 %v1996_v28 }
  0x68   :  { %1561 = vmatprep.subr.bf16.mxu0 %v1890_v0  ;;  %1585 = vmatprep.subr.bf16.mxu1 %v1890_v0 }
  0x69   :  { %1245 = vmatprep.mubr.msk.f32.mxu0 %vm1891_vm0, %v1892_v1 }
  0x6b   :  { %1563 = vmatpush3.bf16.msra.mxu0 %v2000_v34  ;;  %1587 = vmatpush3.bf16.msra.mxu1 %v2000_v34 }
  0x6c   :  { %1564 = vmatprep.subr.bf16.mxu0 %v1890_v0  ;;  %1588 = vmatprep.subr.bf16.mxu1 %v1890_v0 }
  0x6f   :  { %1566 = vmatpush3.bf16.msra.mxu0 %v2004_v40  ;;  %1590 = vmatpush3.bf16.msra.mxu1 %v2004_v40 }
  0x70   :  { %1567 = vmatprep.subr.bf16.mxu0 %v1890_v0  ;;  %1591 = vmatprep.subr.bf16.mxu1 %v1890_v0 }
  0x73   :  { %1569 = vmatpush3.bf16.msra.mxu0 %v2008_v46  ;;  %1593 = vmatpush3.bf16.msra.mxu1 %v2008_v46 }
  0x74   :  { %1570 = vmatprep.subr.bf16.mxu0 %v1890_v0  ;;  %1594 = vmatprep.subr.bf16.mxu1 %v1890_v0 }
  0x77   :  { %1572 = vmatpush3.bf16.msra.mxu0 %v2012_v50  ;;  %1596 = vmatpush3.bf16.msra.mxu1 %v2012_v50 }
  0x78   :  { %1597 = vmatprep.subr.bf16.mxu0 %v1890_v0  ;;  %1621 = vmatprep.subr.bf16.mxu1 %v1890_v0 }
 0x12d   :  { %v1168_v59 = vpop.f32.mrb[0].mxu0  ;;  %v307_v60 = vpop.f32.mrb[0].mxu1 }
 0x12e   :  { %v176_v61 = vpop.f32.mrb[1].mxu0  ;;  %v1212_v62 = vpop.f32.mrb[1].mxu1  ;;  %v182_v11 = vadd.f32 %v1168_v59, %v2058_v58 }
 0x12f   :  { %v177_v63 = vadd.f32 %v2058_v58, %v176_v61 }
 0x131   :  { %v311_v2 = vadd.f32 %v307_v60, %v177_v63  ;;  %v1171_v4 = vpop.f32.mrb[2].mxu0 }
 0x132   :  { %v186_v5 = vpop.f32.mrb[3].mxu0  ;;  %v192_v23 = vadd.f32 %v1171_v4, %v2058_v58 }
 0x133   :  { %1751 = vtanh.f32 %v311_v2  ;;  %v187_v17 = vadd.f32 %v2058_v58, %v186_v5 }
 0x135   :  { %v2079_v6 = vpop.f32.mrb[4].mxu0 }
 0x136   :  { %v2081_v7 = vpop.f32.mrb[5].mxu0 }
 0x137   :  { %v197_v29 = vadd.f32 %v2058_v58, %v2081_v7 }
 0x139   :  { %v2083_v8 = vpop.f32.mrb[6].mxu0 }
 0x13a   :  { %v2085_v10 = vpop.f32.mrb[7].mxu0 }
 0x13b   :  { %v207_v35 = vadd.f32 %v2058_v58, %v2085_v10 }
 0x13d   :  { %v1752_v3 = vpop.eup %1751 }
 0x13e   :  { %1246 = vmatmul.mubr.f32.vlgmr.msra.gmra.mrb[8].mxu0 %v1752_v3 }
 0x13f   :  { %1599 = vmatpush3.bf16.msra.mxu0 %v1985_v9  ;;  %1315 = vmatprep.mubr.msk.f32.mxu0 %vm1891_vm0, %v1892_v1 }
 0x140   :  { %1600 = vmatprep.subr.bf16.mxu0 %v1890_v0 }
 0x143   :  { %1602 = vmatpush3.bf16.msra.mxu0 %v1988_v15 }
 0x144   :  { %1603 = vmatprep.subr.bf16.mxu0 %v1890_v0 }
 0x147   :  { %1605 = vmatpush3.bf16.msra.mxu0 %v1992_v21 }
 0x148   :  { %1606 = vmatprep.subr.bf16.mxu0 %v1890_v0 }
 0x14b   :  { %1608 = vmatpush3.bf16.msra.mxu0 %v1996_v28 }
 0x14c   :  { %1609 = vmatprep.subr.bf16.mxu0 %v1890_v0 }
 0x14f   :  { %1611 = vmatpush3.bf16.msra.mxu0 %v2000_v34 }
 0x150   :  { %1612 = vmatprep.subr.bf16.mxu0 %v1890_v0 }
 0x153   :  { %1614 = vmatpush3.bf16.msra.mxu0 %v2004_v40 }
 0x154   :  { %1615 = vmatprep.subr.bf16.mxu0 %v1890_v0 }
 0x157   :  { %1617 = vmatpush3.bf16.msra.mxu0 %v2008_v46 }
 0x158   :  { %1618 = vmatprep.subr.bf16.mxu0 %v1890_v0 }
 0x15b   :  { %1620 = vmatpush3.bf16.msra.mxu0 %v2012_v50 }
 0x15c   :  { %1645 = vmatprep.subr.bf16.mxu0 %v1890_v0 }
 0x211   :  { %v381_v12 = vpop.f32.mrb[8].mxu0 }
 0x212   :  { %v385_v13 = vadd.f32 %v381_v12, %v182_v11  ;;  %v1247_v14 = vpop.f32.mrb[9].mxu0 }
 0x214   :  { %1753 = vtanh.f32 %v385_v13 }
 0x21e   :  { %v1754_v16 = vpop.eup %1753 }
 0x21f   :  { %1281 = vmatmul.mubr.f32.vlgmr.msra.gmra.mrb[2].mxu1 %v1754_v16 }
 0x220   :  { %1623 = vmatpush3.bf16.msra.mxu1 %v1985_v9  ;;  %1350 = vmatprep.mubr.msk.f32.mxu1 %vm1891_vm0, %v1892_v1 }
 0x221   :  { %1624 = vmatprep.subr.bf16.mxu1 %v1890_v0 }
 0x224   :  { %1626 = vmatpush3.bf16.msra.mxu1 %v1988_v15 }
 0x225   :  { %1627 = vmatprep.subr.bf16.mxu1 %v1890_v0 }
 0x228   :  { %1629 = vmatpush3.bf16.msra.mxu1 %v1992_v21 }
 0x229   :  { %1630 = vmatprep.subr.bf16.mxu1 %v1890_v0 }
 0x22c   :  { %1632 = vmatpush3.bf16.msra.mxu1 %v1996_v28 }
 0x22d   :  { %1633 = vmatprep.subr.bf16.mxu1 %v1890_v0 }
 0x230   :  { %1635 = vmatpush3.bf16.msra.mxu1 %v2000_v34 }
 0x231   :  { %1636 = vmatprep.subr.bf16.mxu1 %v1890_v0 }
 0x234   :  { %1638 = vmatpush3.bf16.msra.mxu1 %v2004_v40 }
 0x235   :  { %1639 = vmatprep.subr.bf16.mxu1 %v1890_v0 }
 0x238   :  { %1641 = vmatpush3.bf16.msra.mxu1 %v2008_v46 }
 0x239   :  { %1642 = vmatprep.subr.bf16.mxu1 %v1890_v0 }
 0x23c   :  { %1644 = vmatpush3.bf16.msra.mxu1 %v2012_v50 }
 0x23d   :  { %1669 = vmatprep.subr.bf16.mxu1 %v1890_v0 }
 0x2f2   :  { %v455_v18 = vpop.f32.mrb[2].mxu1 }
 0x2f3   :  { %v459_v19 = vadd.f32 %v455_v18, %v187_v17  ;;  %v1282_v20 = vpop.f32.mrb[3].mxu1 }
 0x2f5   :  { %1755 = vtanh.f32 %v459_v19 }
 0x2ff   :  { %v1756_v22 = vpop.eup %1755 }
 0x300   :  { %1316 = vmatmul.mubr.f32.vlgmr.msra.gmra.mrb[10].mxu0 %v1756_v22 }
 0x301   :  { %1647 = vmatpush3.bf16.msra.mxu0 %v1985_v9  ;;  %1385 = vmatprep.mubr.msk.f32.mxu0 %vm1891_vm0, %v1892_v1 }
 0x302   :  { %1648 = vmatprep.subr.bf16.mxu0 %v1890_v0 }
 0x305   :  { %1650 = vmatpush3.bf16.msra.mxu0 %v1988_v15 }
 0x306   :  { %1651 = vmatprep.subr.bf16.mxu0 %v1890_v0 }
 0x309   :  { %1653 = vmatpush3.bf16.msra.mxu0 %v1992_v21 }
 0x30a   :  { %1654 = vmatprep.subr.bf16.mxu0 %v1890_v0 }
 0x30d   :  { %1656 = vmatpush3.bf16.msra.mxu0 %v1996_v28 }
 0x30e   :  { %1657 = vmatprep.subr.bf16.mxu0 %v1890_v0 }
 0x311   :  { %1659 = vmatpush3.bf16.msra.mxu0 %v2000_v34 }
 0x312   :  { %1660 = vmatprep.subr.bf16.mxu0 %v1890_v0 }
 0x315   :  { %1662 = vmatpush3.bf16.msra.mxu0 %v2004_v40 }
 0x316   :  { %1663 = vmatprep.subr.bf16.mxu0 %v1890_v0 }
 0x319   :  { %1665 = vmatpush3.bf16.msra.mxu0 %v2008_v46 }
 0x31a   :  { %1666 = vmatprep.subr.bf16.mxu0 %v1890_v0 }
 0x31d   :  { %1668 = vmatpush3.bf16.msra.mxu0 %v2012_v50 }
 0x31e   :  { %1693 = vmatprep.subr.bf16.mxu0 %v1890_v0 }
 0x3d3   :  { %v529_v24 = vpop.f32.mrb[10].mxu0 }
 0x3d4   :  { %v533_v25 = vadd.f32 %v529_v24, %v192_v23  ;;  %v1317_v26 = vpop.f32.mrb[11].mxu0 }
 0x3d6   :  { %1757 = vtanh.f32 %v533_v25 }
 0x3e0   :  { %v1758_v27 = vpop.eup %1757 }
 0x3e1   :  { %1351 = vmatmul.mubr.f32.vlgmr.msra.gmra.mrb[4].mxu1 %v1758_v27 }
 0x3e2   :  { %1671 = vmatpush3.bf16.msra.mxu1 %v1985_v9  ;;  %1420 = vmatprep.mubr.msk.f32.mxu1 %vm1891_vm0, %v1892_v1 }
 0x3e3   :  { %1672 = vmatprep.subr.bf16.mxu1 %v1890_v0 }
 0x3e6   :  { %1674 = vmatpush3.bf16.msra.mxu1 %v1988_v15 }
 0x3e7   :  { %1675 = vmatprep.subr.bf16.mxu1 %v1890_v0 }
 0x3ea   :  { %1677 = vmatpush3.bf16.msra.mxu1 %v1992_v21 }
 0x3eb   :  { %1678 = vmatprep.subr.bf16.mxu1 %v1890_v0 }
 0x3ee   :  { %1680 = vmatpush3.bf16.msra.mxu1 %v1996_v28 }
 0x3ef   :  { %1681 = vmatprep.subr.bf16.mxu1 %v1890_v0 }
 0x3f2   :  { %1683 = vmatpush3.bf16.msra.mxu1 %v2000_v34 }
 0x3f3   :  { %1684 = vmatprep.subr.bf16.mxu1 %v1890_v0 }
 0x3f6   :  { %1686 = vmatpush3.bf16.msra.mxu1 %v2004_v40 }
 0x3f7   :  { %1687 = vmatprep.subr.bf16.mxu1 %v1890_v0 }
 0x3fa   :  { %1689 = vmatpush3.bf16.msra.mxu1 %v2008_v46 }
 0x3fb   :  { %1690 = vmatprep.subr.bf16.mxu1 %v1890_v0 }
 0x3fe   :  { %1692 = vmatpush3.bf16.msra.mxu1 %v2012_v50 }
 0x4b4   :  { %v603_v30 = vpop.f32.mrb[4].mxu1 }
 0x4b5   :  { %v607_v31 = vadd.f32 %v603_v30, %v197_v29  ;;  %v1352_v32 = vpop.f32.mrb[5].mxu1 }
 0x4b7   :  { %1759 = vtanh.f32 %v607_v31 }
 0x4c1   :  { %v1760_v33 = vpop.eup %1759 }
 0x4c2   :  { %1386 = vmatmul.mubr.f32.vlgmr.msra.gmra.mrb[12].mxu0 %v1760_v33 }
 0x4c3   :  { %1695 = vmatpush3.bf16.msra.mxu0 %v1985_v9  ;;  %1455 = vmatprep.mubr.msk.f32.mxu0 %vm1891_vm0, %v1892_v1  ;;  %v202_v9 = vadd.f32 %v2079_v6, %v2058_v58 }
 0x4c4   :  { %1696 = vmatprep.subr.bf16.mxu0 %v1890_v0 }
 0x4c7   :  { %1698 = vmatpush3.bf16.msra.mxu0 %v1988_v15 }
 0x4c8   :  { %1699 = vmatprep.subr.bf16.mxu0 %v1890_v0 }
 0x4cb   :  { %1701 = vmatpush3.bf16.msra.mxu0 %v1992_v21 }
 0x4cc   :  { %1702 = vmatprep.subr.bf16.mxu0 %v1890_v0 }
 0x4cf   :  { %1704 = vmatpush3.bf16.msra.mxu0 %v1996_v28 }
 0x4d0   :  { %1705 = vmatprep.subr.bf16.mxu0 %v1890_v0 }
 0x4d3   :  { %1707 = vmatpush3.bf16.msra.mxu0 %v2000_v34 }
 0x4d4   :  { %1708 = vmatprep.subr.bf16.mxu0 %v1890_v0 }
 0x4d7   :  { %1710 = vmatpush3.bf16.msra.mxu0 %v2004_v40 }
 0x4d8   :  { %1711 = vmatprep.subr.bf16.mxu0 %v1890_v0 }
 0x4db   :  { %1713 = vmatpush3.bf16.msra.mxu0 %v2008_v46 }
 0x4dc   :  { %1714 = vmatprep.subr.bf16.mxu0 %v1890_v0 }
 0x4df   :  { %1716 = vmatpush3.bf16.msra.mxu0 %v2012_v50 }
 0x595   :  { %v677_v15 = vpop.f32.mrb[12].mxu0 }
 0x596   :  { %v681_v21 = vadd.f32 %v677_v15, %v202_v9  ;;  %v1387_v28 = vpop.f32.mrb[13].mxu0 }
 0x598   :  { %1761 = vtanh.f32 %v681_v21 }
 0x5a2   :  { %v1762_v34 = vpop.eup %1761 }
 0x5a3   :  { %1421 = vmatmul.mubr.f32.vlgmr.msra.gmra.mrb[6].mxu1 %v1762_v34 }
 0x676   :  { %v751_v36 = vpop.f32.mrb[6].mxu1 }
 0x677   :  { %v755_v37 = vadd.f32 %v751_v36, %v207_v35  ;;  %v1422_v38 = vpop.f32.mrb[7].mxu1 }
 0x679   :  { %1763 = vtanh.f32 %v755_v37 }
 0x683   :  { %v1764_v39 = vpop.eup %1763 }
 0x684   :  { %1456 = vmatmul.mubr.f32.vlgmr.msra.gmra.mrb[14].mxu0 %v1764_v39 }
 0x685   :  { %1842 = shalt.err (!%p1839_p12)  }
 0x686   :  { %s1843_s18 = scalar_lea.vmem %s76_s10, 2048  ;;  %p1848_p0 = scmp.lt.s32.totalorder %s76_s10, %s76_s10 }
 0x687   :  { %p1844_p13 = scmp.ne.s32.totalorder %s76_s10, %s1843_s18  ;;  %p1849_p1 = scmp.lt.s32.totalorder %s1843_s18, %s1843_s18 }
 0x689   :  { %p1850_p2 = por %p1849_p1, %p1848_p0 }
 0x68b   :  { %p1851_p3 = pnand %p1850_p2, %p1844_p13 }
 0x68d   :  { %1854 = shalt.err (!%p1851_p3)  }
 0x68e   :  { %78 = dma.hbm_to_vmem [thread:$0]  %s2210_s5, 2048, %s76_s10, [#allocation5]  ;;  %v212_v40 = vadd.f32 %v2083_v8, %v2058_v58 }
 0x757   :  { %v825_v41 = vpop.f32.mrb[14].mxu0 }
 0x758   :  { %v829_v42 = vadd.f32 %v825_v41, %v212_v40  ;;  %v1457_v43 = vpop.f32.mrb[15].mxu0 }
 0x75a   :  { %1765 = vtanh.f32 %v829_v42 }
 0x764   :  { %v1766_v44 = vpop.eup %1765 }
 0x765   :  { %1881 = dma.done.wait [#allocation5], 2048 }
 0x766   :  { %1882 = vsyncadd [#allocation5], 4294965248  ;;  %1717 = vmatprep.subr.bf16.mxu1 %v1890_v0  ;;  %1490 = vmatprep.mubr.msk.f32.mxu1 %vm1891_vm0, %v1892_v1  ;;  %v838_v45 = vld [vmem:[#allocation4] sm:$0xff]  ;;  %v839_v46 = vld [vmem:[#allocation4 + $0x8] sm:$0xff]  ;;  %s1894_s21 = smov [#allocation12]  }
 0x767   :  { %v840_v47 = vld [vmem:[#allocation4 + $0x10] sm:$0xff]  ;;  %v1718_v48 = vpack.c.bf16 %v839_v46, %v838_v45  ;;  %v841_v49 = vld [vmem:[#allocation4 + $0x18] sm:$0xff]  ;;  %v842_v51 = vld [vmem:[#allocation4 + $0x20] sm:$0xff]  ;;  %s938_s22 = sshll.u32 %s1894_s21, 4  ;;  %s939_s22 = int_to_ptr.vmem [resolvable:$true] %s938_s22 }
 0x768   :  { %v1721_v50 = vpack.c.bf16 %v841_v49, %v840_v47  ;;  %v843_v52 = vld [vmem:[#allocation4 + $0x28] sm:$0xff]  ;;  %v844_v54 = vld [vmem:[#allocation4 + $0x30] sm:$0xff]  ;;  %v845_v55 = vld [vmem:[#allocation4 + $0x38] sm:$0xff]  ;;  %s1855_s23 = scalar_lea.vmem %s939_s22, 128  ;;  %p1860_p5 = scmp.lt.s32.totalorder %s939_s22, %s939_s22 }
 0x769   :  { %1719 = vmatpush3.bf16.msra.mxu1 %v1718_v48  ;;  %v1724_v53 = vpack.c.bf16 %v843_v52, %v842_v51  ;;  %v1727_v56 = vpack.c.bf16 %v845_v55, %v844_v54  ;;  %v846_v1 = vld [vmem:[#allocation4 + $0x40] sm:$0xff]  ;;  %v847_v57 = vld [vmem:[#allocation4 + $0x48] sm:$0xff]  ;;  %v848_v59 = vld [vmem:[#allocation4 + $0x50] sm:$0xff]  ;;  %p1856_p4 = scmp.ne.s32.totalorder %s939_s22, %s1855_s23  ;;  %p1861_p6 = scmp.lt.s32.totalorder %s1855_s23, %s1855_s23 }
 0x76a   :  { %1720 = vmatprep.subr.bf16.mxu1 %v1890_v0  ;;  %v1730_v58 = vpack.c.bf16 %v847_v57, %v846_v1  ;;  %v849_v60 = vld [vmem:[#allocation4 + $0x58] sm:$0xff]  ;;  %v850_v62 = vld [vmem:[#allocation4 + $0x60] sm:$0xff]  ;;  %v851_v63 = vld [vmem:[#allocation4 + $0x68] sm:$0xff] }
 0x76b   :  { %v1733_v61 = vpack.c.bf16 %v849_v60, %v848_v59  ;;  %v1736_v2 = vpack.c.bf16 %v851_v63, %v850_v62  ;;  %v852_v3 = vld [vmem:[#allocation4 + $0x70] sm:$0xff]  ;;  %v853_v4 = vld [vmem:[#allocation4 + $0x78] sm:$0xff]  ;;  %v955_v6 = vld [vmem:[%s2209_s4] ss:$0 sm:$0xff]  ;;  %p1862_p7 = por %p1861_p6, %p1860_p5 }
 0x76c   :  { %v1739_v5 = vpack.c.bf16 %v853_v4, %v852_v3 }
 0x76d   :  { %1722 = vmatpush3.bf16.msra.mxu1 %v1721_v50  ;;  %p1863_p8 = pnand %p1862_p7, %p1856_p4 }
 0x76e   :  { %1723 = vmatprep.subr.bf16.mxu1 %v1890_v0 }
 0x771   :  { %1725 = vmatpush3.bf16.msra.mxu1 %v1724_v53 }
 0x772   :  { %1726 = vmatprep.subr.bf16.mxu1 %v1890_v0 }
 0x775   :  { %1728 = vmatpush3.bf16.msra.mxu1 %v1727_v56 }
 0x776   :  { %1729 = vmatprep.subr.bf16.mxu1 %v1890_v0 }
 0x779   :  { %1731 = vmatpush3.bf16.msra.mxu1 %v1730_v58 }
 0x77a   :  { %1732 = vmatprep.subr.bf16.mxu1 %v1890_v0 }
 0x77d   :  { %1734 = vmatpush3.bf16.msra.mxu1 %v1733_v61 }
 0x77e   :  { %1735 = vmatprep.subr.bf16.mxu1 %v1890_v0 }
 0x781   :  { %1737 = vmatpush3.bf16.msra.mxu1 %v1736_v2 }
 0x782   :  { %1738 = vmatprep.subr.bf16.mxu1 %v1890_v0 }
 0x785   :  { %1740 = vmatpush3.bf16.msra.mxu1 %v1739_v5 }
 0x788   :  { %1491 = vmatmul.mubr.f32.vlgmr.msra.gmra.mrb[8].mxu1 %v1766_v44 }
 0x85b   :  { %v927_v7 = vpop.f32.mrb[8].mxu1 }
 0x85c   :  { %v928_v8 = vadd.f32 %v955_v6, %v927_v7  ;;  %v1492_v10 = vpop.f32.mrb[9].mxu1 }
 0x85e   :  { %931 = vst [vmem:[#allocation12] sm:$0xff] %v928_v8 }
 0x85f   :  { %1866 = shalt.err (!%p1863_p8)
}
 0x860   :  { %s1867_s27 = scalar_lea.hbm %s2211_s6, 128 }
 0x861   :  { %p1868_p9 = scmp.ne.s32.totalorder %s2211_s6, %s1867_s27  ;;  %p1871_p10 = scmp.lt.u32.totalorder %s1867_s27, %s2211_s6 }
 0x863   :  { %p1873_p11 = pnand %p1871_p10, %p1868_p9 }
 0x865   :  { %1876 = shalt.err (!%p1873_p11)
}
 0x866   :  { %941 = dma.vmem_to_hbm [thread:$0]  %s939_s22, 128, %s2211_s6, [#allocation8]  }
 0x867   :  { %1883 = dma.done.wait [#allocation8], 128  }
 0x868   :  { %1884 = vsyncadd [#allocation8], 4294967168 }
 0x869   :  { %945 = vsyncpa [#allocation7], 1 }
 0x86a   :  { %946 = vsyncpa [#allocation10], 1 }
 0x86b   :  { %947 = vsyncpa [#allocation8], 1 }
 0x86c   :  { %948 = vsyncmov [#allocation5] }
 0x86f   :  { %s949_s0 = vpop.sfrf %948 }
 0x870   :  { %p956_p12 = scmp.ne.s32.totalorder %s949_s0, 0 }
 0x872   :  { %953 = shalt.err (%p956_p12)  }

</bundles_post_ra>
